<compile_context>
chip_gen: v5e
topology: v5e:2x2
jax: 0.10.0
libtpu: 0.0.40
codegen_flags: <defaults>
</compile_context>

<pallas_src>
import jax
import jax.numpy as jnp
import numpy as np
from jax.experimental import pallas as pl
from jax.experimental.pallas import tpu as pltpu


def _round_up(n, m):
    return ((n + m - 1) // m) * m


def _choose_block_batch(B, C, HWp, itemsize, max_block_bytes=4 << 20):
    """Largest divisor of B whose block fits the per-buffer budget, keeping
    at least 2 grid steps when possible (megacore sharding / pipelining)."""
    per_img = C * HWp * itemsize
    best = 1
    for d in range(1, B + 1):
        if B % d:
            continue
        if d * per_img > max_block_bytes:
            continue
        if B // d < 2 and B >= 2:
            continue
        best = d
    return best


def se_kernel(x_ref, w1t_ref, w2t_ref, o_ref):
    # x_ref: (Bt, C, HWp); w1t_ref: (C, C_red) pre-scaled by 1/HW; w2t_ref: (C_red, C)
    x = x_ref[...]
    # Squeeze: sum over the zero-padded lane axis (mean's 1/HW lives in w1t).
    y = jnp.sum(x, axis=-1)                                              # (Bt, C)
    # Excite: fc1 -> ReLU -> fc2 -> sigmoid as MXU matmuls with M = Bt.
    h = jnp.dot(y, w1t_ref[...], preferred_element_type=jnp.float32)    # (Bt, C_red)
    h = jnp.maximum(h, 0.0)
    s = jnp.dot(h, w2t_ref[...], preferred_element_type=jnp.float32)    # (Bt, C)
    s = jax.nn.sigmoid(s)
    # Scale: broadcast the per-channel gate over the lane-dense spatial axis.
    o_ref[...] = (x * s[:, :, None]).astype(o_ref.dtype)


@jax.jit
def se_layer(x, fc1_w, fc2_w):
    """x: (B, C, H, W); fc1_w: (C//r, C); fc2_w: (C, C//r).  Returns (B, C, H, W)."""
    B, C, H, W = x.shape
    HW = H * W
    C_red = fc1_w.shape[0]

    # Lane-dense output layout: pad flattened spatial to a multiple of 128.
    # Zero padding adds nothing to the pooled sum and is sliced away below.
    HWp = max(_round_up(HW, 128), 128)
    x_flat = x.reshape(B, C, HW)
    if HWp != HW:
        x_flat = jnp.pad(x_flat, ((0, 0), (0, 0), (0, HWp - HW)))

    # Pre-transpose weights (no in-kernel transpose) and fold 1/HW into fc1.
    w1t = (fc1_w.astype(jnp.float32) * (1.0 / HW)).T       # (C, C_red)
    w2t = fc2_w.astype(jnp.float32).T                      # (C_red, C)

    itemsize = jnp.dtype(x.dtype).itemsize
    Bt = _choose_block_batch(B, C, HWp, itemsize)
    grid = (B // Bt,)
    # NOTE: if a single image (C*HWp*itemsize) ever exceeds the block budget,
    # a two-pass (pool pass + scale pass) structure would be needed; all
    # ResNet-scale SE feature maps fit comfortably at Bt=1.

    cost = pl.CostEstimate(
        flops=2 * B * C * HWp + 4 * B * C * C_red,
        transcendentals=B * C,
        bytes_accessed=2 * B * C * HWp * itemsize + 2 * C * C_red * 4,
    )

    out_flat = pl.pallas_call(
        se_kernel,
        out_shape=jax.ShapeDtypeStruct((B, C, HWp), x.dtype),
        grid_spec=pltpu.PrefetchScalarGridSpec(
            num_scalar_prefetch=0,
            grid=grid,
            in_specs=[
                pl.BlockSpec((Bt, C, HWp), lambda b: (b, 0, 0)),
                pl.BlockSpec((C, C_red), lambda b: (0, 0)),
                pl.BlockSpec((C_red, C), lambda b: (0, 0)),
            ],
            out_specs=pl.BlockSpec((Bt, C, HWp), lambda b: (b, 0, 0)),
        ),
        compiler_params=pltpu.CompilerParams(
            dimension_semantics=("parallel",),
            vmem_limit_bytes=32 << 20,
        ),
        cost_estimate=cost,
        # Output has identical shape/dtype to x -> write in place (x destroyed).
        input_output_aliases={0: 0},
    )(x_flat, w1t, w2t)

    if HWp != HW:
        out_flat = out_flat[:, :, :HW]
    return out_flat.reshape(B, C, H, W)


def se_layer_ref(x, fc1_w, fc2_w):
    # Pure-JAX reference matching PyTorch SELayer semantics.
    y = jnp.mean(x, axis=(2, 3))                     # (B, C)
    h = jnp.maximum(y @ fc1_w.T, 0.0)                # (B, C//r)
    s = jax.nn.sigmoid(h @ fc2_w.T)                  # (B, C)
    return x * s[:, :, None, None]


if __name__ == "__main__":
    B, C, H, W = 2, 64, 16, 16
    reduction = 16
    C_red = C // reduction

    key = jax.random.PRNGKey(0)
    kx, k1, k2 = jax.random.split(key, 3)
    x = jax.random.normal(kx, (B, C, H, W), dtype=jnp.float32)
    # Deterministic "Linear" weights (PyTorch convention: (out_features, in_features)).
    fc1_w = jax.random.normal(k1, (C_red, C), dtype=jnp.float32) * (1.0 / np.sqrt(C))
    fc2_w = jax.random.normal(k2, (C, C_red), dtype=jnp.float32) * (1.0 / np.sqrt(C_red))

    out = se_layer(x, fc1_w, fc2_w)
    out = jax.block_until_ready(out)

    ref = se_layer_ref(x, fc1_w, fc2_w)
    np.testing.assert_allclose(np.asarray(out), np.asarray(ref), rtol=1e-5, atol=1e-5)

    print("KERNEL_OK")
</pallas_src>

<mosaic_0001>
module attributes {stable_mosaic.version = 11 : i64} {
  func.func @se_kernel(%arg0: i32, %arg1: memref<1x64x256xf32, #tpu.memory_space<vmem>>, %arg2: memref<64x4xf32, #tpu.memory_space<vmem>>, %arg3: memref<4x64xf32, #tpu.memory_space<vmem>>, %arg4: memref<1x64x256xf32, #tpu.memory_space<vmem>>) attributes {dimension_semantics = [#tpu.dimension_semantics<parallel>], iteration_bounds = array<i64: 2>, scalar_prefetch = 0 : i64, scratch_operands = 0 : i64, tpu.core_type = #tpu.core_type<tc>, window_params = [{transform_indices = @transform_0, window_bounds = array<i64: 1, 64, 256>}, {pipeline_mode = #tpu.pipeline_mode<synchronous>, transform_indices = @transform_1, window_bounds = array<i64: 64, 4>}, {pipeline_mode = #tpu.pipeline_mode<synchronous>, transform_indices = @transform_2, window_bounds = array<i64: 4, 64>}, {transform_indices = @transform_3, window_bounds = array<i64: 1, 64, 256>}]} {
    %c0 = arith.constant 0 : index
    %c0_0 = arith.constant 0 : index
    %c0_1 = arith.constant 0 : index
    %0 = vector.load %arg1[%c0, %c0_0, %c0_1] : memref<1x64x256xf32, #tpu.memory_space<vmem>>, vector<1x64x256xf32>
    %cst = arith.constant dense<0.000000e+00> : vector<1x64xf32>
    %1 = vector.multi_reduction <add>, %0, %cst [2] : vector<1x64x256xf32> to vector<1x64xf32>
    %c0_2 = arith.constant 0 : index
    %c0_3 = arith.constant 0 : index
    %2 = vector.load %arg2[%c0_2, %c0_3] : memref<64x4xf32, #tpu.memory_space<vmem>>, vector<64x4xf32>
    %cst_4 = arith.constant dense<0.000000e+00> : vector<1x4xf32>
    %3 = tpu.matmul %1, %2, %cst_4 {dimension_numbers = #tpu.dot_dimension_numbers<[1], [0], [0], [1], [0, 0, 1, 1], [], []>} : vector<1x64xf32>, vector<64x4xf32>, vector<1x4xf32> -> vector<1x4xf32>
    %cst_5 = arith.constant 0.000000e+00 : f32
    %4 = vector.broadcast %cst_5 : f32 to vector<1x4xf32>
    %5 = arith.maximumf %3, %4 : vector<1x4xf32>
    %c0_6 = arith.constant 0 : index
    %c0_7 = arith.constant 0 : index
    %6 = vector.load %arg3[%c0_6, %c0_7] : memref<4x64xf32, #tpu.memory_space<vmem>>, vector<4x64xf32>
    %cst_8 = arith.constant dense<0.000000e+00> : vector<1x64xf32>
    %7 = tpu.matmul %5, %6, %cst_8 {dimension_numbers = #tpu.dot_dimension_numbers<[1], [0], [0], [1], [0, 0, 1, 1], [], []>} : vector<1x4xf32>, vector<4x64xf32>, vector<1x64xf32> -> vector<1x64xf32>
    %8 = arith.negf %7 : vector<1x64xf32>
    %9 = math.exp %8 : vector<1x64xf32>
    %cst_9 = arith.constant 1.000000e+00 : f32
    %10 = vector.broadcast %cst_9 : f32 to vector<1x64xf32>
    %11 = arith.addf %10, %9 : vector<1x64xf32>
    %12 = arith.divf %10, %11 : vector<1x64xf32>
    %13 = vector.shape_cast %12 : vector<1x64xf32> to vector<1x64x1xf32>
    %14 = vector.broadcast %13 : vector<1x64x1xf32> to vector<1x64x256xf32>
    %15 = arith.mulf %0, %14 : vector<1x64x256xf32>
    %c0_10 = arith.constant 0 : index
    %c0_11 = arith.constant 0 : index
    %c0_12 = arith.constant 0 : index
    %16 = vector.load %arg4[%c0_10, %c0_11, %c0_12] : memref<1x64x256xf32, #tpu.memory_space<vmem>>, vector<1x64x256xf32>
    tpu.vector_store %arg4[%c0_10, %c0_11, %c0_12], %15 {strides = array<i32>} : memref<1x64x256xf32, #tpu.memory_space<vmem>>, vector<1x64x256xf32>,
    return
  }
  func.func @transform_0(%arg0: i32) -> (i32, i32, i32) {
    %c0_i32 = arith.constant 0 : i32
    %c0_i32_0 = arith.constant 0 : i32
    %c0_i32_1 = arith.constant 0 : i32
    return %arg0, %c0_i32, %c0_i32_0 : i32, i32, i32
  }
  func.func @transform_1(%arg0: i32) -> (i32, i32) {
    %c0_i32 = arith.constant 0 : i32
    %c0_i32_0 = arith.constant 0 : i32
    %c0_i32_1 = arith.constant 0 : i32
    return %c0_i32, %c0_i32_0 : i32, i32
  }
  func.func @transform_2(%arg0: i32) -> (i32, i32) {
    %c0_i32 = arith.constant 0 : i32
    %c0_i32_0 = arith.constant 0 : i32
    %c0_i32_1 = arith.constant 0 : i32
    return %c0_i32, %c0_i32_0 : i32, i32
  }
  func.func @transform_3(%arg0: i32) -> (i32, i32, i32) {
    %c0_i32 = arith.constant 0 : i32
    %c0_i32_0 = arith.constant 0 : i32
    %c0_i32_1 = arith.constant 0 : i32
    return %arg0, %c0_i32, %c0_i32_0 : i32, i32, i32
  }
}

</mosaic_0001>

<bundles_post_ra>
// kernel: se_layer.1
= control target key start
LH: loop header
LB: loop body
LE: loop exit
PB: predicated region body
PF: predicated region fallthrough
CT: control target
= control target key end

     0   :  { %s532_s12 = smov 0   ;;  %s665_s0 = inlined_call_operand.vmem [shape: f32[2,64,256], index: 0, kind: input, shape index: {}, may-alias: {0,3}]   ;;  %s666_s1 = inlined_call_operand.vmem [shape: f32[64,4], index: 1, kind: input, shape index: {}]   ;;  %s667_s2 = inlined_call_operand.vmem [shape: f32[4,64], index: 2, kind: input, shape index: {}]   ;;  %s668_s3 = inlined_call_operand.vmem [shape: f32[2,64,256], index: 3, kind: output, shape index: {}, may-alias: {0,3}]  }
   0x1 LB: > { %s466_s13 = sadd.s32 4294967295, %s510_s12   ;;  %p470_p0 = scmp.ge.s32.totalorder %s510_s12, 1  ;;  %s510_s12 = sphi %s532_s12, %s13_s12  }
   0x2   : > { %p137_p1 = scmp.lt.s32.totalorder %s510_s12, 3 }
   0x4   : > { %p138_p2 = pnand %p470_p0, %p137_p1 }
   0x5   : > { %p161_p3 = scmp.lt.s32.totalorder (!%p138_p2), %s466_s13, 1 }
   0x6   : > { %141 = sbr.rel (%p138_p2) target bundleno = 588 (0x24c), region = 32 }
   0xb   : > { %s670_s13 = smov (!%p161_p3, %s466_s13), 1  ;;  %v218_v24 = vld [vmem:[%s666_s1 + $0x38] sm:$0xff]  ;;  %v217_v25 = vld [vmem:[%s666_s1 + $0x30] sm:$0xff]  ;;  %v216_v26 = vld [vmem:[%s666_s1 + $0x28] sm:$0xff]  ;;  %v227_v32 = vlaneseq  ;;  %vm232_vm0 = vcmask 130112   ;;  %vm236_vm1 = vcmask 195712  }
   0xc   : > { %s481_s14 = sshll.u32 %s670_s13, 7  ;;  %269 = vmatpush.msra.mxu0 %v218_v24  ;;  %v215_v27 = vld [vmem:[%s666_s1 + $0x20] sm:$0xff]  ;;  %v214_v28 = vld [vmem:[%s666_s1 + $0x18] sm:$0xff]  ;;  %v213_v29 = vld [vmem:[%s666_s1 + $0x10] sm:$0xff]  ;;  %vm240_vm2 = vcmask 261312   ;;  %vm244_vm3 = vcmask 326912  }
   0xd   : > { %s165_s17 = scalar_lea.vmem %s665_s0, %s481_s14  ;;  %v212_v30 = vld [vmem:[%s666_s1 + $0x8] sm:$0xff]  ;;  %v211_v31 = vld [vmem:[%s666_s1] sm:$0xff]  ;;  %v228_v36 = vand.u32 127, %v227_v32  ;;  %vm248_vm4 = vcmask 392512   ;;  %vm252_vm5 = vcmask 458112   ;;  %vm256_vm6 = vcmask 523712   ;;  %s628_s11 = scalar_lea.vmem %s668_s3, %s481_s14 }
   0xe   : > { %v548_v0 = vld [vmem:[%s165_s17] sm:$0xff]  ;;  %v550_v1 = vld [vmem:[%s165_s17 + $0x8] sm:$0xff]  ;;  %v566_v9 = vld [vmem:[%s165_s17 + $0x10] sm:$0xff]  ;;  %270 = vmatpush.msra.mxu0 %v217_v25  ;;  %vm258_vm7 = vcmask 523264   ;;  %vm287_vm8 = vcmask 1043456   ;;  %vm283_vm9 = vcmask 31744  }
   0xf   : > { %v552_v2 = vld [vmem:[%s165_s17 + $0x20] sm:$0xff]  ;;  %v187_v3 = vadd.f32 %v550_v1, %v548_v0  ;;  %v556_v4 = vld [vmem:[%s165_s17 + $0x28] sm:$0xff]  ;;  %v568_v10 = vld [vmem:[%s165_s17 + $0x18] sm:$0xff]  ;;  %v230_v37 = vadd.s32 4294967288, %v228_v36  ;;  %v234_v38 = vadd.s32 4294967280, %v228_v36  ;;  %v238_v39 = vadd.s32 4294967272, %v228_v36 }
  0x10   : > { %v558_v5 = vld [vmem:[%s165_s17 + $0x40] sm:$0xff]  ;;  %v560_v6 = vld [vmem:[%s165_s17 + $0x48] sm:$0xff]  ;;  %v193_v7 = vadd.f32 %v556_v4, %v552_v2  ;;  %v570_v11 = vld [vmem:[%s165_s17 + $0x30] sm:$0xff]  ;;  %v190_v15 = vadd.f32 %v568_v10, %v566_v9  ;;  %271 = vmatpush.msra.mxu0 %v216_v26  ;;  %v242_v42 = vadd.s32 4294967264, %v228_v36  ;;  %v246_v47 = vadd.s32 4294967256, %v228_v36 }
  0x11   : > { %v199_v8 = vadd.f32 %v560_v6, %v558_v5  ;;  %188 = vadd.xlane.f32.xlu0 %v187_v3  ;;  %v572_v12 = vld [vmem:[%s165_s17 + $0x38] sm:$0xff]  ;;  %v574_v13 = vld [vmem:[%s165_s17 + $0x50] sm:$0xff]  ;;  %v584_v18 = vld [vmem:[%s165_s17 + $0x60] sm:$0xff]  ;;  %v250_v53 = vadd.s32 4294967248, %v228_v36  ;;  %v254_v55 = vadd.s32 4294967240, %v228_v36 }
  0x12   : > { %194 = vadd.xlane.f32.xlu1 %v193_v7  ;;  %v576_v14 = vld [vmem:[%s165_s17 + $0x58] sm:$0xff]  ;;  %v196_v16 = vadd.f32 %v572_v12, %v570_v11  ;;  %v586_v19 = vld [vmem:[%s165_s17 + $0x68] sm:$0xff]  ;;  %v588_v20 = vld [vmem:[%s165_s17 + $0x70] sm:$0xff]  ;;  %272 = vmatpush.msra.mxu0 %v215_v27 }
  0x13   : > { %200 = vadd.xlane.f32.xlu2 %v199_v8  ;;  %v202_v17 = vadd.f32 %v576_v14, %v574_v13  ;;  %v590_v21 = vld [vmem:[%s165_s17 + $0x78] sm:$0xff]  ;;  %v205_v22 = vadd.f32 %v586_v19, %v584_v18  ;;  %v282_v3 = vld [vmem:[%s667_s2] sm:$0xf] }
  0x14   : > { %v208_v23 = vadd.f32 %v590_v21, %v588_v20  ;;  %273 = vmatpush.msra.mxu0 %v214_v28  ;;  %476 = vmatpush.msk.msra.mxu1 %vm287_vm8, %v282_v3 }
  0x16   : > { %274 = vmatpush.msra.mxu0 %v213_v29 }
  0x18   : > { %275 = vmatpush.msra.mxu0 %v212_v30 }
  0x19   : > { %191 = vadd.xlane.f32.xlu0 %v190_v15  ;;  %v332_v15 = vshrl.u32 %v227_v32, 7 }
  0x1a   : > { %197 = vadd.xlane.f32.xlu1 %v196_v16  ;;  %276 = vmatpush.msra.mxu0 %v211_v31 }
  0x1b   : > { %203 = vadd.xlane.f32.xlu2 %v202_v17  ;;  %v345_v16 = vadd.s32 16, %v332_v15  ;;  %v339_v17 = vadd.s32 8, %v332_v15 }
  0x1c   : > { %491 = vset.pattern.permute.xlu2 %v332_v15 }
  0x1d   : > { %493 = vset.pattern.permute.xlu1 %v345_v16  ;;  %492 = vset.pattern.permute.xlu0 %v339_v17 }
  0x21   : > { %206 = vadd.xlane.f32.xlu0 %v205_v22 }
  0x22   : > { %209 = vadd.xlane.f32.xlu1 %v208_v23 }
  0x84   : > { %v189_v33 = vpop.xlane.xlu0 %188 }
  0x85   : > { %v195_v34 = vpop.xlane.xlu1 %194  ;;  %v229_v41 = vperm.slane %v189_v33, %v228_v36 }
  0x86   : > { %v201_v35 = vpop.xlane.xlu2 %200  ;;  %v235_v45 = vperm.slane %v195_v34, %v234_v38  ;;  %v351_v38 = vadd.s32 24, %v332_v15 }
  0x87   : > { %v243_v51 = vperm.slane %v201_v35, %v242_v42 }
  0x8c   : > { %v192_v40 = vpop.xlane.xlu0 %191 }
  0x8d   : > { %v231_v43 = vperm.slane %v192_v40, %v230_v37  ;;  %v198_v44 = vpop.xlane.xlu1 %197  ;;  %v363_v37 = vadd.s32 40, %v332_v15  ;;  %v357_v40 = vadd.s32 32, %v332_v15 }
  0x8e   : > { %v239_v46 = vperm.slane %v198_v44, %v238_v39  ;;  %v204_v49 = vpop.xlane.xlu2 %203  ;;  %v375_v39 = vadd.s32 56, %v332_v15 }
  0x8f   : > { %v233_v48 = vsel %vm232_vm0, %v231_v43, %v229_v41  ;;  %v247_v54 = vperm.slane %v204_v49, %v246_v47  ;;  %v369_v41 = vadd.s32 48, %v332_v15 }
  0x90   : > { %v237_v50 = vsel %vm236_vm1, %v235_v45, %v233_v48 }
  0x91   : > { %v241_v52 = vsel %vm240_vm2, %v239_v46, %v237_v50 }
  0x92   : > { %v245_v56 = vsel %vm244_vm3, %v243_v51, %v241_v52 }
  0x93   : > { %v249_v60 = vsel %vm248_vm4, %v247_v54, %v245_v56 }
  0x94   : > { %v207_v57 = vpop.xlane.xlu0 %206 }
  0x95   : > { %v251_v58 = vperm.slane %v207_v57, %v250_v53  ;;  %v210_v59 = vpop.xlane.xlu1 %209 }
  0x96   : > { %v255_v61 = vperm.slane %v210_v59, %v254_v55 }
  0x97   : > { %v253_v62 = vsel %vm252_vm5, %v251_v58, %v249_v60 }
  0x98   : > { %v257_v63 = vsel %vm256_vm6, %v255_v61, %v253_v62 }
  0x99   : > { %475 = vmatmul.msk.f32.vlgmr.msra.gmra.mxu0 %vm258_vm7, %v257_v63 }
 0x116   : > { %v278_v7 = vpop.f32.mrf.mxu0 }
 0x117   : > { %v281_v8 = vmax.f32 %v278_v7, 0.0 }
 0x119   : > { %477 = vmatmul.msk.f32.vlgmr.msra.gmra.mxu1 %vm283_vm9, %v281_v8 }
 0x196   : > { %v308_v22 = vpop.f32.mrf.mxu1 }
 0x197   : > { %v478_v23 = vmul.f32 -1.442695, %v308_v22 }
 0x199   : > { %500 = vpow2.f32 %v478_v23 }
 0x19f   : > { %v501_v24 = vpop.eup %500 }
 0x1a0   : > { %v314_v25 = vadd.f32 1.0, %v501_v24 }
 0x1a2   : > { %502 = vrcp.f32 %v314_v25  ;;  %v326_v29 = vand.u32 2147483648, %v314_v25  ;;  %v324_v31 = vand.u32 2147483647, %v314_v25  ;;  %vm320_vm11 = vweird.f32 %v314_v25 }
 0x1a4   : > { %v327_v32 = vor.u32 1.1754944e-38, %v326_v29  ;;  %vm325_vm13 = vcmp.eq.f32.partialorder %v324_v31, 8.507059e+37 }
 0x1a8   : > { %v503_v26 = vpop.eup %502 }
 0x1a9   : > { %v316_v27 = vmul.f32 %v503_v26, %v314_v25  ;;  %vm321_vm10 = vweird.f32 %v503_v26 }
 0x1aa   : > { %vm322_vm12 = vmor %vm320_vm11, %vm321_vm10 }
 0x1ab   : > { %v317_v28 = vsub.f32 1.0, %v316_v27 }
 0x1ad   : > { %v318_v30 = vmul.f32 %v503_v26, %v317_v28 }
 0x1af   : > { %v319_v33 = vadd.f32 %v503_v26, %v318_v30 }
 0x1b1   : > { %v323_v34 = vsel %vm322_vm12, %v503_v26, %v319_v33 }
 0x1b2   : > { %v328_v35 = vsel %vm325_vm13, %v327_v32, %v323_v34 }
 0x1b3   : > { %v330_v36 = vperm.slane %v328_v35, 0 }
 0x1b5   : > { %347 = vperm.xlu1 %493, %v330_v36   ;;  %341 = vperm.xlu0 %492, %v330_v36  }
 0x1b6   : > { %335 = vperm.xlu2 %491, %v330_v36  }
 0x1bd   : > { %496 = vset.pattern.permute.xlu1 %v363_v37  ;;  %499 = vset.pattern.permute.xlu0 %v375_v39 }
 0x1be   : > { %494 = vset.pattern.permute.xlu2 %v351_v38 }
 0x1c5   : > { %365 = vperm.xlu1 %496, %v330_v36  }
 0x1c6   : > { %353 = vperm.xlu2 %494, %v330_v36  }
 0x1cd   : > { %498 = vset.pattern.permute.xlu1 %v375_v39 }
 0x1ce   : > { %495 = vset.pattern.permute.xlu2 %v357_v40 }
 0x1d5   : > { %377 = vperm.xlu1 %498, %v330_v36  }
 0x1d6   : > { %359 = vperm.xlu2 %495, %v330_v36  }
 0x1de   : > { %497 = vset.pattern.permute.xlu2 %v369_v41 }
 0x1e6   : > { %371 = vperm.xlu2 %497, %v330_v36  }
 0x210   : > { %v336_v42 = vpop.permute.xlu2 %335 }
 0x211   : > { %v379_v43 = vmul.f32 %v336_v42, %v548_v0  ;;  %v380_v44 = vmul.f32 %v336_v42, %v550_v1 }
 0x213   : > { %395 = vst [vmem:[%s628_s11] sm:$0xff] %v379_v43 }
 0x214   : > { %396 = vst [vmem:[%s628_s11 + $0x8] sm:$0xff] %v380_v44 }
 0x220   : > { %v354_v45 = vpop.permute.xlu2 %353 }
 0x221   : > { %v385_v46 = vmul.f32 %v354_v45, %v570_v11  ;;  %v386_v47 = vmul.f32 %v354_v45, %v572_v12 }
 0x223   : > { %401 = vst [vmem:[%s628_s11 + $0x30] sm:$0xff] %v385_v46 }
 0x224   : > { %402 = vst [vmem:[%s628_s11 + $0x38] sm:$0xff] %v386_v47 }
 0x227   : > { %v348_v48 = vpop.permute.xlu1 %347  ;;  %v342_v49 = vpop.permute.xlu0 %341 }
 0x228   : > { %v383_v0 = vmul.f32 %v348_v48, %v552_v2  ;;  %v384_v1 = vmul.f32 %v348_v48, %v556_v4  ;;  %v381_v50 = vmul.f32 %v342_v49, %v566_v9  ;;  %v382_v51 = vmul.f32 %v342_v49, %v568_v10 }
 0x22a   : > { %399 = vst [vmem:[%s628_s11 + $0x20] sm:$0xff] %v383_v0 }
 0x22b   : > { %400 = vst [vmem:[%s628_s11 + $0x28] sm:$0xff] %v384_v1 }
 0x22c   : > { %397 = vst [vmem:[%s628_s11 + $0x10] sm:$0xff] %v381_v50 }
 0x22d   : > { %398 = vst [vmem:[%s628_s11 + $0x18] sm:$0xff] %v382_v51 }
 0x230   : > { %v360_v11 = vpop.permute.xlu2 %359 }
 0x231   : > { %v387_v12 = vmul.f32 %v360_v11, %v558_v5  ;;  %v388_v52 = vmul.f32 %v360_v11, %v560_v6 }
 0x233   : > { %403 = vst [vmem:[%s628_s11 + $0x40] sm:$0xff] %v387_v12 }
 0x234   : > { %404 = vst [vmem:[%s628_s11 + $0x48] sm:$0xff] %v388_v52 }
 0x237   : > { %v366_v2 = vpop.permute.xlu1 %365 }
 0x238   : > { %v389_v4 = vmul.f32 %v366_v2, %v574_v13  ;;  %v390_v9 = vmul.f32 %v366_v2, %v576_v14 }
 0x23a   : > { %405 = vst [vmem:[%s628_s11 + $0x50] sm:$0xff] %v389_v4 }
 0x23b   : > { %406 = vst [vmem:[%s628_s11 + $0x58] sm:$0xff] %v390_v9 }
 0x240   : > { %v372_v10 = vpop.permute.xlu2 %371 }
 0x241   : > { %v391_v53 = vmul.f32 %v372_v10, %v584_v18  ;;  %v392_v54 = vmul.f32 %v372_v10, %v586_v19 }
 0x243   : > { %407 = vst [vmem:[%s628_s11 + $0x60] sm:$0xff] %v391_v53 }
 0x244   : > { %408 = vst [vmem:[%s628_s11 + $0x68] sm:$0xff] %v392_v54 }
 0x247   : > { %v378_v5 = vpop.permute.xlu1 %377 }
 0x248   : > { %v393_v6 = vmul.f32 %v378_v5, %v588_v20  ;;  %v394_v55 = vmul.f32 %v378_v5, %v590_v21 }
 0x24a   : > { %409 = vst [vmem:[%s628_s11 + $0x70] sm:$0xff] %v393_v6 }
 0x24b   : > { %410 = vst [vmem:[%s628_s11 + $0x78] sm:$0xff] %v394_v55 }
 0x24c PF: > { %s13_s12 = sadd.s32 1, %s510_s12  }
 0x24d   : > { %p10_p4 = scmp.ge.s32.totalorder %s13_s12, 4  }
 0x24f   :  { %12 = sbr.rel (!%p10_p4) target bundleno = 1 (0x1), region = 62 }

</bundles_post_ra>
